<compile_context>
chip_gen: v7x
topology: tpu7x:2x2x1
jax: 0.10.0
libtpu: 0.0.40
codegen_flags: <defaults>
</compile_context>

<pallas_src>
import jax
import jax.numpy as jnp
from jax.experimental import pallas as pl
from jax.experimental.pallas import tpu as pltpu

NSENSOR = 48          # nInputSensor
FEAT = 20             # sensorNet output width / DecoderS h_dim
MAX_BATCH_TILE = 1024  # generation-portable batch tile (fits v7x 64 MiB VMEM)


# ------------------------------- kernel helpers -------------------------------
def _relu(t):
    return jnp.maximum(t, 0.0)


def _layer(w_ref, x, b_ref):
    # (out, in) @ (in, TB) + (out, 1) -> (out, TB); f32 accumulation on the MXU.
    return jnp.dot(w_ref[...], x, preferred_element_type=jnp.float32) + b_ref[...]


def _encode(x, w1, b1, w2, b2, w3, b3, wl, bl):
    t = _relu(_layer(w1, x, b1))
    t = _relu(_layer(w2, t, b2))
    feat = _relu(_layer(w3, t, b3))          # x_ in the torch code
    hid = _relu(_layer(wl, feat, bl))
    return hid, feat


# ---- mode 1: sensorNet (48->60->40->20, ReLU) then Linear(20->H) + ReLU ------
def mode1_kernel(x_ref, w1, b1, w2, b2, w3, b3, wl, bl, hid_ref, feat_ref):
    hid, feat = _encode(x_ref[...], w1, b1, w2, b2, w3, b3, wl, bl)
    hid_ref[...] = hid
    feat_ref[...] = feat


# ---- mode 2: relu(W_l^T h + biasDecoder) then DecoderS (40->60->48, sigmoid) -
def mode2_kernel(h_ref, wlT, bdec, d1, db1, d2, db2, d3, db3, feat_ref, rsen_ref):
    # wlT is the init-time transposed copy of `linear.weight` (tied to wl),
    # so F.linear(h, linear.weight.t()) is just another W @ X here.
    x = _relu(_layer(wlT, h_ref[...], bdec))
    feat_ref[...] = x
    y = _relu(_layer(d1, x, db1))
    y = _relu(_layer(d2, y, db2))
    y = _layer(d3, y, db3)
    rsen_ref[...] = jax.nn.sigmoid(y)


# ---- mode 3: sensorNet -> Linear(20->H)+ReLU -> LinearOutput(H->O) -----------
def mode3_kernel(x_ref, w1, b1, w2, b2, w3, b3, wl, bl, wo, bo, out_ref):
    hid, _ = _encode(x_ref[...], w1, b1, w2, b2, w3, b3, wl, bl)
    out_ref[...] = _layer(wo, hid, bo)       # no activation on the output layer


# ---- fused mode 1 + mode 3 (shared encoder computed once) --------------------
def mode13_kernel(x_ref, w1, b1, w2, b2, w3, b3, wl, bl, wo, bo,
                  hid_ref, feat_ref, out_ref):
    hid, feat = _encode(x_ref[...], w1, b1, w2, b2, w3, b3, wl, bl)
    hid_ref[...] = hid
    feat_ref[...] = feat
    out_ref[...] = _layer(wo, hid, bo)


# --------------------------------- launcher -----------------------------------
def _launch(kernel, act, weights, out_channels, batch_tile=None):
    """Run `kernel` over a 1-D batch grid.

    act:          (C_in, B) channels-major activation input (tiled over batch).
    weights:      tuple of 2-D parameter arrays (constant index_map, VMEM-resident).
    out_channels: tuple of output channel counts; outputs are (C_out, B).
    """
    c_in, batch = act.shape
    tb = batch if batch <= MAX_BATCH_TILE else MAX_BATCH_TILE
    if batch_tile is not None:
        tb = min(batch_tile, batch)
    grid = (pl.cdiv(batch, tb),)

    act_spec = pl.BlockSpec((c_in, tb), lambda i: (0, i))
    const_specs = [pl.BlockSpec(w.shape, lambda i: (0, 0)) for w in weights]
    out_specs = tuple(pl.BlockSpec((c, tb), lambda i: (0, i)) for c in out_channels)
    out_shape = tuple(jax.ShapeDtypeStruct((c, batch), jnp.float32)
                      for c in out_channels)
    if len(out_channels) == 1:
        out_specs, out_shape = out_specs[0], out_shape[0]

    return pl.pallas_call(
        kernel,
        grid=grid,
        in_specs=[act_spec] + const_specs,
        out_specs=out_specs,
        out_shape=out_shape,
        compiler_params=pltpu.CompilerParams(
            dimension_semantics=("parallel",)),   # batch sharded across v7x's 2 TCs
    )(act, *weights)


def basic_pars_forward(params, x=None, h=None, mode=1, batch_tile=None):
    """Channels-major forward.  x: (nSensor, B), h: (no_hidden, B).

    mode 1  -> (hid (H,B), feat (20,B))
    mode 2  -> (feat (20,B), r_sen (nSensor,B))
    mode 3  -> out (O,B)
    mode 13 -> (hid, feat, out)   fused mode-1 + mode-3 (shared layers run once)
    """
    p = params
    enc_w = (p["w1"], p["b1"], p["w2"], p["b2"], p["w3"], p["b3"], p["wl"], p["bl"])
    n_hidden = p["wl"].shape[0]
    n_output = p["wo"].shape[0]
    n_sensor = p["w1"].shape[1]

    if mode == 1:
        return _launch(mode1_kernel, x, enc_w, (n_hidden, FEAT), batch_tile)
    if mode == 2:
        w = (p["wlT"], p["bdec"],
             p["d1"], p["db1"], p["d2"], p["db2"], p["d3"], p["db3"])
        return _launch(mode2_kernel, h, w, (FEAT, n_sensor), batch_tile)
    if mode == 3:
        return _launch(mode3_kernel, x, enc_w + (p["wo"], p["bo"]),
                       (n_output,), batch_tile)
    if mode == 13:
        return _launch(mode13_kernel, x, enc_w + (p["wo"], p["bo"]),
                       (n_hidden, FEAT, n_output), batch_tile)
    raise ValueError("mode must be 1, 2, 3, or 13")


# ------------------------------ parameter init --------------------------------
def _xavier(key, fan_out, fan_in):
    bound = (6.0 / (fan_in + fan_out)) ** 0.5
    return jax.random.uniform(key, (fan_out, fan_in), jnp.float32, -bound, bound)


def init_params(key, n_sensor=NSENSOR, no_hidden=32, no_output=8):
    ks = jax.random.split(key, 8)
    z = lambda c: jnp.zeros((c, 1), jnp.float32)
    p = {}
    # sensorNet Conv1d (k=1) -> (out, in) matmul weights; xavier, zero bias.
    p["w1"], p["b1"] = _xavier(ks[0], 60, n_sensor), z(60)
    p["w2"], p["b2"] = _xavier(ks[1], 40, 60), z(40)
    p["w3"], p["b3"] = _xavier(ks[2], FEAT, 40), z(FEAT)
    # linear (20 -> H) and linearOutput (H -> O): xavier, zero bias.
    p["wl"], p["bl"] = _xavier(ks[3], no_hidden, FEAT), z(no_hidden)
    p["wo"], p["bo"] = _xavier(ks[4], no_output, no_hidden), z(no_output)
    # Transposed copy of `linear.weight` for mode 2 (tied to wl; avoids a
    # per-call XLA transpose in the wrapper).
    p["wlT"] = p["wl"].T
    # biasDecoder
    p["bdec"] = z(FEAT)

    # DecoderS ConvTranspose1d (k=1) layers stored (out, in); torch-style
    # uniform(+-1/sqrt(in)) init.
    def convt(k, cin, cout):
        bound = 1.0 / (cin ** 0.5)
        kw, kb = jax.random.split(k)
        return (jax.random.uniform(kw, (cout, cin), jnp.float32, -bound, bound),
                jax.random.uniform(kb, (cout, 1), jnp.float32, -bound, bound))

    p["d1"], p["db1"] = convt(ks[5], FEAT, 40)
    p["d2"], p["db2"] = convt(ks[6], 40, 60)
    p["d3"], p["db3"] = convt(ks[7], 60, n_sensor)
    return p


# -------------------------- pure-JAX reference (check) ------------------------
def _ref(params, x=None, h=None, mode=1):
    relu = lambda t: jnp.maximum(t, 0.0)
    lay = lambda w, a, b: w @ a + b
    p = params
    if mode in (1, 3, 13):
        t = relu(lay(p["w1"], x, p["b1"]))
        t = relu(lay(p["w2"], t, p["b2"]))
        feat = relu(lay(p["w3"], t, p["b3"]))
        hid = relu(lay(p["wl"], feat, p["bl"]))
        if mode == 1:
            return hid, feat
        out = lay(p["wo"], hid, p["bo"])
        if mode == 3:
            return out
        return hid, feat, out
    x_ = relu(p["wl"].T @ h + p["bdec"])        # checks the wlT tie as well
    y = relu(lay(p["d1"], x_, p["db1"]))
    y = relu(lay(p["d2"], y, p["db2"]))
    return x_, jax.nn.sigmoid(lay(p["d3"], y, p["db3"]))


if __name__ == "__main__":
    key = jax.random.PRNGKey(0)
    pkey, xkey, hkey, xgkey = jax.random.split(key, 4)
    B, NO_HIDDEN, NO_OUTPUT = 8, 32, 8

    params = init_params(pkey, NSENSOR, NO_HIDDEN, NO_OUTPUT)
    # channels-major inputs: (channels, batch)
    x = jax.random.normal(xkey, (NSENSOR, B), jnp.float32)
    h = jax.random.normal(hkey, (NO_HIDDEN, B), jnp.float32)

    y1, feat1 = basic_pars_forward(params, x=x, mode=1)
    feat2, rsen = basic_pars_forward(params, h=h, mode=2)
    y3 = basic_pars_forward(params, x=x, mode=3)
    hid13, feat13, out13 = basic_pars_forward(params, x=x, mode=13)
    jax.block_until_ready((y1, feat1, feat2, rsen, y3, hid13, feat13, out13))

    assert y1.shape == (NO_HIDDEN, B) and feat1.shape == (FEAT, B)
    assert feat2.shape == (FEAT, B) and rsen.shape == (NSENSOR, B)
    assert y3.shape == (NO_OUTPUT, B)

    def check(a, b):
        assert a.shape == b.shape
        assert jnp.allclose(a, b, atol=1e-4, rtol=1e-4), \
            float(jnp.max(jnp.abs(a - b)))

    r1, rf1 = _ref(params, x=x, mode=1)
    rf2, rr = _ref(params, h=h, mode=2)
    r3 = _ref(params, x=x, mode=3)
    for a, b in ((y1, r1), (feat1, rf1), (feat2, rf2), (rsen, rr), (y3, r3),
                 (hid13, r1), (feat13, rf1), (out13, r3)):
        check(a, b)

    # Exercise the batch grid (2 pipelined steps of 128 rows on the lane axis).
    Bg = 256
    xg = jax.random.normal(xgkey, (NSENSOR, Bg), jnp.float32)
    yg, fg = basic_pars_forward(params, x=xg, mode=1, batch_tile=128)
    jax.block_until_ready((yg, fg))
    rg, rfg = _ref(params, x=xg, mode=1)
    check(yg, rg)
    check(fg, rfg)

    print("KERNEL_OK")
</pallas_src>

<mosaic_0001>
module attributes {stable_mosaic.version = 11 : i64} {
  func.func @mode1_kernel(%arg0: i32, %arg1: memref<48x8xf32, #tpu.memory_space<vmem>>, %arg2: memref<60x48xf32, #tpu.memory_space<vmem>>, %arg3: memref<60x1xf32, #tpu.memory_space<vmem>>, %arg4: memref<40x60xf32, #tpu.memory_space<vmem>>, %arg5: memref<40x1xf32, #tpu.memory_space<vmem>>, %arg6: memref<20x40xf32, #tpu.memory_space<vmem>>, %arg7: memref<20x1xf32, #tpu.memory_space<vmem>>, %arg8: memref<32x20xf32, #tpu.memory_space<vmem>>, %arg9: memref<32x1xf32, #tpu.memory_space<vmem>>, %arg10: memref<32x8xf32, #tpu.memory_space<vmem>>, %arg11: memref<20x8xf32, #tpu.memory_space<vmem>>) attributes {dimension_semantics = [#tpu.dimension_semantics<parallel>], iteration_bounds = array<i64: 1>, scalar_prefetch = 0 : i64, scratch_operands = 0 : i64, tpu.core_type = #tpu.core_type<tc>, window_params = [{transform_indices = @transform_0, window_bounds = array<i64: 48, 8>}, {pipeline_mode = #tpu.pipeline_mode<synchronous>, transform_indices = @transform_1, window_bounds = array<i64: 60, 48>}, {pipeline_mode = #tpu.pipeline_mode<synchronous>, transform_indices = @transform_2, window_bounds = array<i64: 60, 1>}, {pipeline_mode = #tpu.pipeline_mode<synchronous>, transform_indices = @transform_3, window_bounds = array<i64: 40, 60>}, {pipeline_mode = #tpu.pipeline_mode<synchronous>, transform_indices = @transform_4, window_bounds = array<i64: 40, 1>}, {pipeline_mode = #tpu.pipeline_mode<synchronous>, transform_indices = @transform_5, window_bounds = array<i64: 20, 40>}, {pipeline_mode = #tpu.pipeline_mode<synchronous>, transform_indices = @transform_6, window_bounds = array<i64: 20, 1>}, {pipeline_mode = #tpu.pipeline_mode<synchronous>, transform_indices = @transform_7, window_bounds = array<i64: 32, 20>}, {pipeline_mode = #tpu.pipeline_mode<synchronous>, transform_indices = @transform_8, window_bounds = array<i64: 32, 1>}, {transform_indices = @transform_9, window_bounds = array<i64: 32, 8>}, {transform_indices = @transform_10, window_bounds = array<i64: 20, 8>}]} {
    %c0 = arith.constant 0 : index
    %c0_0 = arith.constant 0 : index
    %0 = vector.load %arg1[%c0, %c0_0] : memref<48x8xf32, #tpu.memory_space<vmem>>, vector<48x8xf32>
    %c0_1 = arith.constant 0 : index
    %c0_2 = arith.constant 0 : index
    %1 = vector.load %arg2[%c0_1, %c0_2] : memref<60x48xf32, #tpu.memory_space<vmem>>, vector<60x48xf32>
    %cst = arith.constant dense<0.000000e+00> : vector<60x8xf32>
    %2 = tpu.matmul %1, %0, %cst {dimension_numbers = #tpu.dot_dimension_numbers<[1], [0], [0], [1], [0, 0, 1, 1], [], []>} : vector<60x48xf32>, vector<48x8xf32>, vector<60x8xf32> -> vector<60x8xf32>
    %c0_3 = arith.constant 0 : index
    %c0_4 = arith.constant 0 : index
    %3 = vector.load %arg3[%c0_3, %c0_4] : memref<60x1xf32, #tpu.memory_space<vmem>>, vector<60x1xf32>
    %4 = vector.broadcast %3 : vector<60x1xf32> to vector<60x8xf32>
    %5 = arith.addf %2, %4 : vector<60x8xf32>
    %cst_5 = arith.constant 0.000000e+00 : f32
    %6 = vector.broadcast %cst_5 : f32 to vector<60x8xf32>
    %7 = arith.maximumf %5, %6 : vector<60x8xf32>
    %c0_6 = arith.constant 0 : index
    %c0_7 = arith.constant 0 : index
    %8 = vector.load %arg4[%c0_6, %c0_7] : memref<40x60xf32, #tpu.memory_space<vmem>>, vector<40x60xf32>
    %cst_8 = arith.constant dense<0.000000e+00> : vector<40x8xf32>
    %9 = tpu.matmul %8, %7, %cst_8 {dimension_numbers = #tpu.dot_dimension_numbers<[1], [0], [0], [1], [0, 0, 1, 1], [], []>} : vector<40x60xf32>, vector<60x8xf32>, vector<40x8xf32> -> vector<40x8xf32>
    %c0_9 = arith.constant 0 : index
    %c0_10 = arith.constant 0 : index
    %10 = vector.load %arg5[%c0_9, %c0_10] : memref<40x1xf32, #tpu.memory_space<vmem>>, vector<40x1xf32>
    %11 = vector.broadcast %10 : vector<40x1xf32> to vector<40x8xf32>
    %12 = arith.addf %9, %11 : vector<40x8xf32>
    %cst_11 = arith.constant 0.000000e+00 : f32
    %13 = vector.broadcast %cst_11 : f32 to vector<40x8xf32>
    %14 = arith.maximumf %12, %13 : vector<40x8xf32>
    %c0_12 = arith.constant 0 : index
    %c0_13 = arith.constant 0 : index
    %15 = vector.load %arg6[%c0_12, %c0_13] : memref<20x40xf32, #tpu.memory_space<vmem>>, vector<20x40xf32>
    %cst_14 = arith.constant dense<0.000000e+00> : vector<20x8xf32>
    %16 = tpu.matmul %15, %14, %cst_14 {dimension_numbers = #tpu.dot_dimension_numbers<[1], [0], [0], [1], [0, 0, 1, 1], [], []>} : vector<20x40xf32>, vector<40x8xf32>, vector<20x8xf32> -> vector<20x8xf32>
    %c0_15 = arith.constant 0 : index
    %c0_16 = arith.constant 0 : index
    %17 = vector.load %arg7[%c0_15, %c0_16] : memref<20x1xf32, #tpu.memory_space<vmem>>, vector<20x1xf32>
    %18 = vector.broadcast %17 : vector<20x1xf32> to vector<20x8xf32>
    %19 = arith.addf %16, %18 : vector<20x8xf32>
    %cst_17 = arith.constant 0.000000e+00 : f32
    %20 = vector.broadcast %cst_17 : f32 to vector<20x8xf32>
    %21 = arith.maximumf %19, %20 : vector<20x8xf32>
    %c0_18 = arith.constant 0 : index
    %c0_19 = arith.constant 0 : index
    %22 = vector.load %arg8[%c0_18, %c0_19] : memref<32x20xf32, #tpu.memory_space<vmem>>, vector<32x20xf32>
    %cst_20 = arith.constant dense<0.000000e+00> : vector<32x8xf32>
    %23 = tpu.matmul %22, %21, %cst_20 {dimension_numbers = #tpu.dot_dimension_numbers<[1], [0], [0], [1], [0, 0, 1, 1], [], []>} : vector<32x20xf32>, vector<20x8xf32>, vector<32x8xf32> -> vector<32x8xf32>
    %c0_21 = arith.constant 0 : index
    %c0_22 = arith.constant 0 : index
    %24 = vector.load %arg9[%c0_21, %c0_22] : memref<32x1xf32, #tpu.memory_space<vmem>>, vector<32x1xf32>
    %25 = vector.broadcast %24 : vector<32x1xf32> to vector<32x8xf32>
    %26 = arith.addf %23, %25 : vector<32x8xf32>
    %cst_23 = arith.constant 0.000000e+00 : f32
    %27 = vector.broadcast %cst_23 : f32 to vector<32x8xf32>
    %28 = arith.maximumf %26, %27 : vector<32x8xf32>
    %c0_24 = arith.constant 0 : index
    %c0_25 = arith.constant 0 : index
    %29 = vector.load %arg10[%c0_24, %c0_25] : memref<32x8xf32, #tpu.memory_space<vmem>>, vector<32x8xf32>
    tpu.vector_store %arg10[%c0_24, %c0_25], %28 {strides = array<i32>} : memref<32x8xf32, #tpu.memory_space<vmem>>, vector<32x8xf32>,
    %c0_26 = arith.constant 0 : index
    %c0_27 = arith.constant 0 : index
    %30 = vector.load %arg11[%c0_26, %c0_27] : memref<20x8xf32, #tpu.memory_space<vmem>>, vector<20x8xf32>
    tpu.vector_store %arg11[%c0_26, %c0_27], %21 {strides = array<i32>} : memref<20x8xf32, #tpu.memory_space<vmem>>, vector<20x8xf32>,
    return
  }
  func.func @transform_0(%arg0: i32) -> (i32, i32) {
    %c0_i32 = arith.constant 0 : i32
    %c0_i32_0 = arith.constant 0 : i32
    return %c0_i32, %arg0 : i32, i32
  }
  func.func @transform_1(%arg0: i32) -> (i32, i32) {
    %c0_i32 = arith.constant 0 : i32
    %c0_i32_0 = arith.constant 0 : i32
    %c0_i32_1 = arith.constant 0 : i32
    return %c0_i32, %c0_i32_0 : i32, i32
  }
  func.func @transform_2(%arg0: i32) -> (i32, i32) {
    %c0_i32 = arith.constant 0 : i32
    %c0_i32_0 = arith.constant 0 : i32
    %c0_i32_1 = arith.constant 0 : i32
    return %c0_i32, %c0_i32_0 : i32, i32
  }
  func.func @transform_3(%arg0: i32) -> (i32, i32) {
    %c0_i32 = arith.constant 0 : i32
    %c0_i32_0 = arith.constant 0 : i32
    %c0_i32_1 = arith.constant 0 : i32
    return %c0_i32, %c0_i32_0 : i32, i32
  }
  func.func @transform_4(%arg0: i32) -> (i32, i32) {
    %c0_i32 = arith.constant 0 : i32
    %c0_i32_0 = arith.constant 0 : i32
    %c0_i32_1 = arith.constant 0 : i32
    return %c0_i32, %c0_i32_0 : i32, i32
  }
  func.func @transform_5(%arg0: i32) -> (i32, i32) {
    %c0_i32 = arith.constant 0 : i32
    %c0_i32_0 = arith.constant 0 : i32
    %c0_i32_1 = arith.constant 0 : i32
    return %c0_i32, %c0_i32_0 : i32, i32
  }
  func.func @transform_6(%arg0: i32) -> (i32, i32) {
    %c0_i32 = arith.constant 0 : i32
    %c0_i32_0 = arith.constant 0 : i32
    %c0_i32_1 = arith.constant 0 : i32
    return %c0_i32, %c0_i32_0 : i32, i32
  }
  func.func @transform_7(%arg0: i32) -> (i32, i32) {
    %c0_i32 = arith.constant 0 : i32
    %c0_i32_0 = arith.constant 0 : i32
    %c0_i32_1 = arith.constant 0 : i32
    return %c0_i32, %c0_i32_0 : i32, i32
  }
  func.func @transform_8(%arg0: i32) -> (i32, i32) {
    %c0_i32 = arith.constant 0 : i32
    %c0_i32_0 = arith.constant 0 : i32
    %c0_i32_1 = arith.constant 0 : i32
    return %c0_i32, %c0_i32_0 : i32, i32
  }
  func.func @transform_9(%arg0: i32) -> (i32, i32) {
    %c0_i32 = arith.constant 0 : i32
    %c0_i32_0 = arith.constant 0 : i32
    return %c0_i32, %arg0 : i32, i32
  }
  func.func @transform_10(%arg0: i32) -> (i32, i32) {
    %c0_i32 = arith.constant 0 : i32
    %c0_i32_0 = arith.constant 0 : i32
    return %c0_i32, %arg0 : i32, i32
  }
}

</mosaic_0001>

<bundles_post_ra>
// kernel: tpu_custom_call.1
= control target key start
LH: loop header
LB: loop body
LE: loop exit
PB: predicated region body
PF: predicated region fallthrough
CT: control target
= control target key end

     0   :  { %vm96_vm0 = vcmask 392192   ;;  %v840_v3 = vmov 0   ;;  %v841_v38 = vmov 0.0|0.0   ;;  %vm842_vm1 = vmmov 0   ;;  %s1103_s0 = inlined_call_operand.vmem [shape: f32[48,8], index: 0, kind: input, shape index: {}]   ;;  %s1104_s1 = inlined_call_operand.vmem [shape: f32[60,48], index: 1, kind: input, shape index: {}]   ;;  %s1105_s2 = inlined_call_operand.vmem [shape: f32[60,1], index: 2, kind: input, shape index: {}]   ;;  %s1106_s4 = inlined_call_operand.vmem [shape: f32[40,1], index: 4, kind: input, shape index: {}]   ;;  %s1107_s6 = inlined_call_operand.vmem [shape: f32[20,1], index: 6, kind: input, shape index: {}]   ;;  %s1108_s8 = inlined_call_operand.vmem [shape: f32[32,1], index: 8, kind: input, shape index: {}]   ;;  %s1109_s3 = inlined_call_operand.vmem [shape: f32[40,60], index: 3, kind: input, shape index: {}]   ;;  %s1110_s5 = inlined_call_operand.vmem [shape: f32[20,40], index: 5, kind: input, shape index: {}]   ;;  %s1111_s7 = inlined_call_operand.vmem [shape: f32[32,20], index: 7, kind: input, shape index: {}]   ;;  %s1112_s10 = inlined_call_operand.vmem [shape: f32[20,8], index: 10, kind: output, shape index: {1}]   ;;  %s1113_s9 = inlined_call_operand.vmem [shape: f32[32,8], index: 9, kind: output, shape index: {0}]  }
   0x1   :  { %v34_v0 = vld [vmem:[%s1103_s0] sm:$0xff]  ;;  %v35_v1 = vld [vmem:[%s1103_s0 + $0x8] sm:$0xff]  ;;  %v36_v2 = vld [vmem:[%s1103_s0 + $0x10] sm:$0xff]  ;;  %838 = vset.pattern.permute.xlu0 %v840_v3  ;;  %839 = vset.pattern.permute.xlu1 %v840_v3  ;;  %v843_v39 = vmov 0.0   ;;  %vm285_vm2 = vcmask 1043456   ;;  %vm844_vm3 = vmmov 1  }
   0x2   :  { %v798_v4 = vpack.c.bf16 %v35_v1, %v34_v0  ;;  %v37_v5 = vld [vmem:[%s1103_s0 + $0x18] sm:$0xff]  ;;  %v38_v7 = vld [vmem:[%s1103_s0 + $0x20] sm:$0xff]  ;;  %v39_v8 = vld [vmem:[%s1103_s0 + $0x28] sm:$0xff]  ;;  %810 = vmatprep.subr.bf16.mxu1 %v841_v38  ;;  %752 = vmatprep.mubr.msk.f32.mxu1 %vm842_vm1, %v843_v39  ;;  %vm269_vm5 = vcmask 490496   ;;  %vm405_vm6 = vcmask 326656   ;;  %vm526_vm7 = vcmask 162816  }
   0x3   :  { %v802_v6 = vpack.c.bf16 %v37_v5, %v36_v2  ;;  %v40_v9 = vld [vmem:[%s1104_s1] sm:$0xff]  ;;  %v806_v11 = vpack.c.bf16 %v39_v8, %v38_v7  ;;  %v50_v12 = vld [vmem:[%s1105_s2 + $0x10] sm:$0xff]  ;;  %v49_v13 = vld [vmem:[%s1105_s2 + $0x8] sm:$0xff]  ;;  %vm631_vm8 = vcmask 64512   ;;  %vm638_vm9 = vcmask 60416  }
   0x4   :  { %799 = vmatprep.subr.bf16.mxu0 %v798_v4  ;;  %724 = vmatprep.mubr.msk.f32.mxu0 %vm96_vm0, %v40_v9  ;;  %v48_v10 = vld [vmem:[%s1105_s2] sm:$0xff]  ;;  %v51_v14 = vld [vmem:[%s1105_s2 + $0x18] sm:$0xff]  ;;  %v53_v16 = vld [vmem:[%s1105_s2 + $0x28] sm:$0xff] }
   0x5   :  { %801 = vmatpush3.bf16.msra.mxu0 %v798_v4  ;;  %58 = vperm.xlu0 %838, %v48_v10   ;;  %v52_v15 = vld [vmem:[%s1105_s2 + $0x20] sm:$0xff]  ;;  %v41_v17 = vld [vmem:[%s1104_s1 + $0x8] sm:$0xff]  ;;  %v42_v18 = vld [vmem:[%s1104_s1 + $0x10] sm:$0xff] }
   0x6   :  { %803 = vmatprep.subr.bf16.mxu0 %v802_v6  ;;  %68 = vperm.xlu1 %839, %v50_v12   ;;  %v54_v19 = vld [vmem:[%s1105_s2 + $0x30] sm:$0xff]  ;;  %v55_v20 = vld [vmem:[%s1105_s2 + $0x38] sm:$0xf]  ;;  %v44_v22 = vld [vmem:[%s1104_s1 + $0x20] sm:$0xff] }
   0x7   :  { %v43_v21 = vld [vmem:[%s1104_s1 + $0x18] sm:$0xff]  ;;  %v239_v23 = vld [vmem:[%s1106_s4] sm:$0xff]  ;;  %v240_v24 = vld [vmem:[%s1106_s4 + $0x8] sm:$0xff] }
   0x8   :  { %v45_v25 = vld [vmem:[%s1104_s1 + $0x28] sm:$0xff]  ;;  %v46_v26 = vld [vmem:[%s1104_s1 + $0x30] sm:$0xff]  ;;  %v242_v28 = vld [vmem:[%s1106_s4 + $0x18] sm:$0xff] }
   0x9   :  { %805 = vmatpush3.bf16.msra.mxu0 %v802_v6  ;;  %63 = vperm.xlu0 %838, %v49_v13   ;;  %v241_v27 = vld [vmem:[%s1106_s4 + $0x10] sm:$0xff]  ;;  %v47_v29 = vld [vmem:[%s1104_s1 + $0x38] sm:$0xf]  ;;  %v243_v30 = vld [vmem:[%s1106_s4 + $0x20] sm:$0xff] }
   0xa   :  { %807 = vmatprep.subr.bf16.mxu0 %v806_v11  ;;  %73 = vperm.xlu1 %839, %v51_v14   ;;  %v387_v31 = vld [vmem:[%s1107_s6] sm:$0xff]  ;;  %v388_v32 = vld [vmem:[%s1107_s6 + $0x8] sm:$0xff]  ;;  %v389_v33 = vld [vmem:[%s1107_s6 + $0x10] sm:$0xf] }
   0xb   :  { %v502_v34 = vld [vmem:[%s1108_s8] sm:$0xff]  ;;  %v503_v35 = vld [vmem:[%s1108_s8 + $0x8] sm:$0xff]  ;;  %v504_v36 = vld [vmem:[%s1108_s8 + $0x10] sm:$0xff] }
   0xc   :  { %v505_v37 = vld [vmem:[%s1108_s8 + $0x18] sm:$0xff]  ;;  %vm821_vm4 = vmpackc.low %vm285_vm2, %vm844_vm3  ;;  %v234_v12 = vld [vmem:[%s1109_s3] sm:$0xff] }
   0xd   :  { %809 = vmatpush3.bf16.msra.mxu0 %v806_v11  ;;  %78 = vperm.xlu0 %838, %v52_v15   ;;  %v235_v13 = vld [vmem:[%s1109_s3 + $0x8] sm:$0xff]  ;;  %v236_v14 = vld [vmem:[%s1109_s3 + $0x10] sm:$0xff]  ;;  %v237_v15 = vld [vmem:[%s1109_s3 + $0x18] sm:$0xff] }
   0xe   :  { %83 = vperm.xlu1 %839, %v53_v16   ;;  %823 = vmatprep.subr.bf16.mxu0 %v841_v38  ;;  %v238_v16 = vld [vmem:[%s1109_s3 + $0x20] sm:$0xff] }
  0x10   :  { %725 = vmatmul.mubr.msk.f32.vlgmr.msra.gmra.mrb[0].mxu0 %vm96_vm0, %v41_v17 }
  0x11   :  { %727 = vmatprep.mubr.msk.f32.mxu0 %vm96_vm0, %v42_v18  ;;  %88 = vperm.xlu0 %838, %v54_v19  }
  0x12   :  { %93 = vperm.xlu1 %839, %v55_v20  }
  0x14   :  { %728 = vmatmul.mubr.msk.f32.gmra.mrb[2].mxu0 %vm96_vm0, %v43_v21 }
  0x15   :  { %730 = vmatprep.mubr.msk.f32.mxu0 %vm96_vm0, %v44_v22  ;;  %246 = vperm.xlu0 %838, %v239_v23  }
  0x16   :  { %251 = vperm.xlu1 %839, %v240_v24  }
  0x18   :  { %731 = vmatmul.mubr.msk.f32.gmra.mrb[4].mxu0 %vm96_vm0, %v45_v25 }
  0x19   :  { %733 = vmatprep.mubr.msk.f32.mxu0 %vm96_vm0, %v46_v26  ;;  %256 = vperm.xlu0 %838, %v241_v27  }
  0x1a   :  { %261 = vperm.xlu1 %839, %v242_v28  }
  0x1c   :  { %734 = vmatmul.mubr.msk.f32.gmra.mrb[6].mxu0 %vm96_vm0, %v47_v29 }
  0x1d   :  { %266 = vperm.xlu0 %838, %v243_v30   ;;  %777 = vmatprep.mubr.msk.f32.mxu0 %vm842_vm1, %v843_v39 }
  0x1e   :  { %392 = vperm.xlu1 %839, %v387_v31  }
  0x21   :  { %397 = vperm.xlu0 %838, %v388_v32  }
  0x22   :  { %402 = vperm.xlu1 %839, %v389_v33  }
  0x25   :  { %508 = vperm.xlu0 %838, %v502_v34  }
  0x26   :  { %513 = vperm.xlu1 %839, %v503_v35  }
  0x29   :  { %518 = vperm.xlu0 %838, %v504_v36  }
  0x2a   :  { %523 = vperm.xlu1 %839, %v505_v37  }
  0x84   :  { %v59_v40 = vpop.permute.xlu0 %58 }
  0x85   :  { %v69_v41 = vpop.permute.xlu1 %68 }
  0x88   :  { %v64_v42 = vpop.permute.xlu0 %63 }
  0x89   :  { %v74_v43 = vpop.permute.xlu1 %73 }
  0x8c   :  { %v79_v56 = vpop.permute.xlu0 %78 }
  0x8d   :  { %v84_v53 = vpop.permute.xlu1 %83 }
  0x90   :  { %v89_v4 = vpop.permute.xlu0 %88 }
  0x91   :  { %v94_v1 = vpop.permute.xlu1 %93 }
  0x94   :  { %v247_v19 = vpop.permute.xlu0 %246 }
  0x95   :  { %v252_v21 = vpop.permute.xlu1 %251 }
  0x98   :  { %v257_v30 = vpop.permute.xlu0 %256 }
  0x99   :  { %v262_v32 = vpop.permute.xlu1 %261 }
  0xe3   :  { %v726_v44 = vpop.f32.mrb[0].mxu0 }
  0xe4   :  { %v193_v45 = vadd.f32 %v726_v44, %v64_v42  ;;  %v187_v46 = vpop.f32.mrb[1].mxu0 }
  0xe5   :  { %v188_v47 = vadd.f32 %v187_v46, %v59_v40  ;;  %v267_v40 = vpop.permute.xlu0 %266  ;;  %v384_v46 = vld [vmem:[%s1110_s5] sm:$0xff] }
  0xe6   :  { %v227_v48 = vmax.f32 %v193_v45, 0.0 }
  0xe7   :  { %v226_v49 = vmax.f32 %v188_v47, 0.0  ;;  %v729_v50 = vpop.f32.mrb[2].mxu0  ;;  %v386_v47 = vld [vmem:[%s1110_s5 + $0x10] sm:$0xf] }
  0xe8   :  { %v203_v51 = vadd.f32 %v729_v50, %v74_v43  ;;  %v197_v52 = vpop.f32.mrb[3].mxu0 }
  0xe9   :  { %v198_v54 = vadd.f32 %v197_v52, %v69_v41  ;;  %v811_v55 = vpack.c.bf16 %v227_v48, %v226_v49  ;;  %v498_v48 = vld [vmem:[%s1111_s7] sm:$0xff]  ;;  %v393_v49 = vpop.permute.xlu1 %392 }
  0xea   :  { %v229_v57 = vmax.f32 %v203_v51, 0.0 }
  0xeb   :  { %v228_v58 = vmax.f32 %v198_v54, 0.0  ;;  %v732_v59 = vpop.f32.mrb[4].mxu0  ;;  %812 = vmatpush3.bf16.msra.mxu1 %v811_v55  ;;  %v398_v54 = vpop.permute.xlu0 %397 }
  0xec   :  { %v213_v60 = vadd.f32 %v732_v59, %v84_v53  ;;  %v207_v61 = vpop.f32.mrb[5].mxu0  ;;  %813 = vmatprep.subr.bf16.mxu1 %v841_v38 }
  0xed   :  { %v814_v62 = vpack.c.bf16 %v229_v57, %v228_v58  ;;  %v208_v63 = vadd.f32 %v207_v61, %v79_v56  ;;  %v403_v58 = vpop.permute.xlu1 %402 }
  0xee   :  { %v231_v0 = vmax.f32 %v213_v60, 0.0 }
  0xef   :  { %v230_v2 = vmax.f32 %v208_v63, 0.0  ;;  %v735_v3 = vpop.f32.mrb[6].mxu0  ;;  %815 = vmatpush3.bf16.msra.mxu1 %v814_v62 }
  0xf0   :  { %v223_v5 = vadd.f32 %v735_v3, %v94_v1  ;;  %v217_v6 = vpop.f32.mrb[7].mxu0  ;;  %816 = vmatprep.subr.bf16.mxu1 %v841_v38  ;;  %v500_v1 = vld [vmem:[%s1111_s7 + $0x10] sm:$0xff] }
  0xf1   :  { %v817_v7 = vpack.c.bf16 %v231_v0, %v230_v2  ;;  %v218_v8 = vadd.f32 %v217_v6, %v89_v4  ;;  %v499_v0 = vld [vmem:[%s1111_s7 + $0x8] sm:$0xff]  ;;  %v501_v2 = vld [vmem:[%s1111_s7 + $0x18] sm:$0xff]  ;;  %v514_v3 = vpop.permute.xlu1 %513  ;;  %v509_v4 = vpop.permute.xlu0 %508 }
  0xf2   :  { %v233_v9 = vmax.f32 %v223_v5, 0.0 }
  0xf3   :  { %v232_v10 = vmax.f32 %v218_v8, 0.0  ;;  %818 = vmatpush3.bf16.msra.mxu1 %v817_v7 }
  0xf4   :  { %819 = vmatprep.subr.bf16.mxu1 %v841_v38 }
  0xf5   :  { %v820_v11 = vpack.c.bf16 %v233_v9, %v232_v10  ;;  %v524_v10 = vpop.permute.xlu1 %523 }
  0xf7   :  { %822 = vmatpush3.bf16.msk.msra.mxu1 %vm821_vm4, %v820_v11 }
  0xfa   :  { %753 = vmatmul.mubr.msk.f32.vlgmr.msra.gmra.mrb[0].mxu1 %vm269_vm5, %v234_v12 }
  0xfb   :  { %755 = vmatprep.mubr.msk.f32.mxu1 %vm842_vm1, %v843_v39 }
  0xfe   :  { %756 = vmatmul.mubr.msk.f32.gmra.mrb[2].mxu1 %vm269_vm5, %v235_v13  ;;  %v519_v13 = vpop.permute.xlu0 %518 }
  0xff   :  { %758 = vmatprep.mubr.msk.f32.mxu1 %vm842_vm1, %v843_v39 }
 0x102   :  { %759 = vmatmul.mubr.msk.f32.gmra.mrb[4].mxu1 %vm269_vm5, %v236_v14 }
 0x103   :  { %761 = vmatprep.mubr.msk.f32.mxu1 %vm842_vm1, %v843_v39 }
 0x106   :  { %762 = vmatmul.mubr.msk.f32.gmra.mrb[6].mxu1 %vm269_vm5, %v237_v15 }
 0x107   :  { %764 = vmatprep.mubr.msk.f32.mxu1 %vm842_vm1, %v843_v39 }
 0x10a   :  { %765 = vmatmul.mubr.msk.f32.gmra.mrb[8].mxu1 %vm269_vm5, %v238_v16 }
 0x10b   :  { %792 = vmatprep.mubr.msk.f32.mxu1 %vm526_vm7, %v498_v48 }
 0x1cd   :  { %v355_v17 = vpop.f32.mrb[0].mxu1 }
 0x1ce   :  { %v754_v18 = vpop.f32.mrb[1].mxu1  ;;  %v356_v20 = vadd.f32 %v355_v17, %v247_v19 }
 0x1d0   :  { %v379_v25 = vmax.f32 %v356_v20, 0.0 }
 0x1d1   :  { %v360_v22 = vpop.f32.mrb[2].mxu1 }
 0x1d2   :  { %v361_v23 = vadd.f32 %v360_v22, %v252_v21  ;;  %v757_v24 = vpop.f32.mrb[3].mxu1 }
 0x1d4   :  { %v380_v26 = vmax.f32 %v361_v23, 0.0 }
 0x1d5   :  { %v365_v27 = vpop.f32.mrb[4].mxu1 }
 0x1d6   :  { %v824_v28 = vpack.c.bf16 %v380_v26, %v379_v25  ;;  %v760_v29 = vpop.f32.mrb[5].mxu1  ;;  %v366_v31 = vadd.f32 %v365_v27, %v257_v30 }
 0x1d8   :  { %825 = vmatpush3.bf16.msra.mxu0 %v824_v28  ;;  %v381_v36 = vmax.f32 %v366_v31, 0.0 }
 0x1d9   :  { %v370_v33 = vpop.f32.mrb[6].mxu1  ;;  %826 = vmatprep.subr.bf16.mxu0 %v841_v38  ;;  %v385_v38 = vld [vmem:[%s1110_s5 + $0x8] sm:$0xff] }
 0x1da   :  { %v371_v34 = vadd.f32 %v370_v33, %v262_v32  ;;  %v763_v35 = vpop.f32.mrb[7].mxu1 }
 0x1dc   :  { %v382_v37 = vmax.f32 %v371_v34, 0.0 }
 0x1dd   :  { %v375_v41 = vpop.f32.mrb[8].mxu1 }
 0x1de   :  { %v827_v42 = vpack.c.bf16 %v382_v37, %v381_v36  ;;  %v376_v43 = vadd.f32 %v375_v41, %v267_v40  ;;  %v766_v44 = vpop.f32.mrb[9].mxu1 }
 0x1e0   :  { %828 = vmatpush3.bf16.msra.mxu0 %v827_v42  ;;  %v383_v45 = vmax.f32 %v376_v43, 0.0 }
 0x1e1   :  { %775 = vmatprep.subr.mxu0 %v843_v39 }
 0x1e4   :  { %776 = vmatpush3.msra.mxu0 %v383_v45 }
 0x1e5   :  { %778 = vmatmul.mubr.msk.f32.vlgmr.msra.gmra.mrb[8].mxu0 %vm405_vm6, %v384_v46 }
 0x1e6   :  { %780 = vmatprep.mubr.msk.f32.mxu0 %vm842_vm1, %v843_v39 }
 0x1e9   :  { %781 = vmatmul.mubr.msk.f32.gmra.mrb[10].mxu0 %vm405_vm6, %v385_v38 }
 0x1ea   :  { %783 = vmatprep.mubr.msk.f32.mxu0 %vm842_vm1, %v843_v39 }
 0x1ed   :  { %784 = vmatmul.mubr.msk.f32.gmra.mrb[12].mxu0 %vm405_vm6, %v386_v47 }
 0x2b8   :  { %v481_v50 = vpop.f32.mrb[8].mxu0 }
 0x2b9   :  { %v482_v51 = vadd.f32 %v481_v50, %v393_v49  ;;  %v779_v52 = vpop.f32.mrb[9].mxu0 }
 0x2bb   :  { %v495_v53 = vmax.f32 %v482_v51, 0.0 }
 0x2bc   :  { %v486_v39 = vpop.f32.mrb[10].mxu0 }
 0x2bd   :  { %636 = vst.msk [vmem:[%s1112_s10] sm:$0xff] %vm631_vm8, %v495_v53  ;;  %v487_v55 = vadd.f32 %v486_v39, %v398_v54  ;;  %v782_v56 = vpop.f32.mrb[11].mxu0 }
 0x2bf   :  { %v496_v57 = vmax.f32 %v487_v55, 0.0 }
 0x2c0   :  { %v491_v59 = vpop.f32.mrb[12].mxu0 }
 0x2c1   :  { %v829_v60 = vpack.c.bf16 %v496_v57, %v495_v53  ;;  %637 = vst.msk [vmem:[%s1112_s10 + $0x8] sm:$0xff] %vm631_vm8, %v496_v57  ;;  %v492_v61 = vadd.f32 %v491_v59, %v403_v58  ;;  %v785_v62 = vpop.f32.mrb[13].mxu0 }
 0x2c3   :  { %v497_v63 = vmax.f32 %v492_v61, 0.0  ;;  %830 = vmatprep.subr.bf16.mxu1 %v829_v60 }
 0x2c4   :  { %832 = vmatpush3.bf16.msra.mxu1 %v829_v60 }
 0x2c5   :  { %639 = vst.msk [vmem:[%s1112_s10 + $0x10] sm:$0xf] %vm638_vm9, %v497_v63  ;;  %790 = vmatprep.subr.msk.mxu1 %vm285_vm2, %v497_v63 }
 0x2c8   :  { %791 = vmatpush3.msk.msra.mxu1 %vm285_vm2, %v497_v63 }
 0x2c9   :  { %793 = vmatmul.mubr.msk.f32.vlgmr.msra.gmra.mrb[10].mxu1 %vm526_vm7, %v499_v0 }
 0x2ca   :  { %795 = vmatprep.mubr.msk.f32.mxu1 %vm526_vm7, %v500_v1 }
 0x2cd   :  { %796 = vmatmul.mubr.msk.f32.gmra.mrb[12].mxu1 %vm526_vm7, %v501_v2 }
 0x39c   :  { %v794_v5 = vpop.f32.mrb[10].mxu1 }
 0x39d   :  { %v614_v6 = vadd.f32 %v794_v5, %v514_v3  ;;  %v608_v7 = vpop.f32.mrb[11].mxu1 }
 0x39e   :  { %v609_v8 = vadd.f32 %v608_v7, %v509_v4 }
 0x39f   :  { %v628_v9 = vmax.f32 %v614_v6, 0.0 }
 0x3a0   :  { %v627_v11 = vmax.f32 %v609_v8, 0.0  ;;  %v797_v12 = vpop.f32.mrb[12].mxu1 }
 0x3a1   :  { %633 = vst.msk [vmem:[%s1113_s9 + $0x8] sm:$0xff] %vm631_vm8, %v628_v9  ;;  %v624_v14 = vadd.f32 %v797_v12, %v524_v10  ;;  %v618_v15 = vpop.f32.mrb[13].mxu1 }
 0x3a2   :  { %632 = vst.msk [vmem:[%s1113_s9] sm:$0xff] %vm631_vm8, %v627_v11  ;;  %v619_v16 = vadd.f32 %v618_v15, %v519_v13 }
 0x3a3   :  { %v630_v17 = vmax.f32 %v624_v14, 0.0 }
 0x3a4   :  { %v629_v18 = vmax.f32 %v619_v16, 0.0 }
 0x3a5   :  { %635 = vst.msk [vmem:[%s1113_s9 + $0x18] sm:$0xff] %vm631_vm8, %v630_v17 }
 0x3a6   :  { %634 = vst.msk [vmem:[%s1113_s9 + $0x10] sm:$0xff] %vm631_vm8, %v629_v18 }

</bundles_post_ra>
